<compile_context>
chip_gen: v5e
topology: v5e:2x2
jax: 0.10.0
libtpu: 0.0.40
codegen_flags: <defaults>
</compile_context>

<pallas_src>
import functools

import jax
import jax.numpy as jnp
from jax.experimental import pallas as pl
from jax.experimental.pallas import tpu as pltpu


def _round_up(x, m):
    return -(-x // m) * m


def _decoder_kernel(x_ref, w1_ref, b1_ref, w2_ref, b2_ref, w34_ref, b34_ref,
                    o_ref, *, o1, o2):
    """Fused Decoder forward for one batch tile.

    x_ref   : (tb, Din)   float32 (cast to compute dtype in-kernel), pipelined
    w1_ref  : (Din, H)    compute dtype, whole-array VMEM resident
    w2_ref  : (H, H)      compute dtype
    w34_ref : (H, Opad)   compute dtype, fc3|fc4 fused and zero lane-padded
    b*_ref  : (1, F)      float32
    o_ref   : (tb, Opad)  [:, :o1] = fc3 out, [:, o1:o1+o2] = softmax(fc4)
    """
    # In-kernel cast of x (idle VALU slots; avoids a standalone XLA cast op).
    x = x_ref[...].astype(w1_ref.dtype)

    # fc1 + relu (MXU matmul, f32 accumulation; bias/relu on VPU in f32).
    h = jnp.dot(x, w1_ref[...], preferred_element_type=jnp.float32)
    h = jnp.maximum(h + b1_ref[...], 0.0)

    # fc2 + relu
    h = jnp.dot(h.astype(w2_ref.dtype), w2_ref[...],
                preferred_element_type=jnp.float32)
    h = jnp.maximum(h + b2_ref[...], 0.0)

    # fc3 and fc4 fused into a single matmul on the shared activation h.
    z = jnp.dot(h.astype(w34_ref.dtype), w34_ref[...],
                preferred_element_type=jnp.float32)
    z = z + b34_ref[...]

    # Masked softmax over the fc4 lanes [o1, o1+o2). fc3 lanes pass through
    # raw; zero-padded lanes stay 0. The mask is built at (1, Opad) and
    # broadcast, keeping the final store a single unmasked lane-dense slab.
    opad = z.shape[-1]
    col = jax.lax.broadcasted_iota(jnp.int32, (1, opad), 1)
    is_p = jnp.logical_and(col >= o1, col < o1 + o2)
    zl = jnp.where(is_p, z, -jnp.inf)
    m = jnp.max(zl, axis=-1, keepdims=True)
    e = jnp.where(is_p, jnp.exp(zl - m), 0.0)
    denom = jnp.sum(e, axis=-1, keepdims=True)
    # EUP approximate reciprocal + one Newton-Raphson step (~f32 accuracy,
    # no VPU divide on the critical path).
    r = pl.reciprocal(denom, approx=True)
    r = r * (2.0 - denom * r)
    probs = e * r

    o_ref[...] = jnp.where(is_p, probs, z).astype(o_ref.dtype)


def prepare_params(params, *, compute_dtype=jnp.bfloat16):
    """One-time parameter preparation (hoisted out of the per-call hot path).

    Fuses fc3|fc4 into a single lane-dense (H, Opad) weight (zero padded to a
    multiple of 128 lanes), pre-casts MXU operands to compute_dtype and
    reshapes biases to (1, F) f32.

    Returns (arrays, dims) where dims are Python ints (Din, H, O1, O2, Opad).
    """
    W1, b1 = params["W1"], params["b1"]
    W2, b2 = params["W2"], params["b2"]
    W3, b3 = params["W3"], params["b3"]
    W4, b4 = params["W4"], params["b4"]
    Din, H = W1.shape
    O1 = W3.shape[1]
    O2 = W4.shape[1]
    O34 = O1 + O2
    Opad = _round_up(O34, 128)

    W34 = jnp.zeros((H, Opad), jnp.float32)
    W34 = W34.at[:, :O1].set(W3).at[:, O1:O34].set(W4)
    b34 = jnp.zeros((1, Opad), jnp.float32)
    b34 = b34.at[:, :O1].set(b3.reshape(1, O1)).at[:, O1:O34].set(b4.reshape(1, O2))

    arrays = {
        "W1": W1.astype(compute_dtype),
        "b1": b1.reshape(1, H).astype(jnp.float32),
        "W2": W2.astype(compute_dtype),
        "b2": b2.reshape(1, H).astype(jnp.float32),
        "W34": W34.astype(compute_dtype),
        "b34": b34,  # f32
    }
    dims = {"Din": Din, "H": H, "O1": O1, "O2": O2, "Opad": Opad}
    return arrays, dims


def make_decoder_forward(params, *, compute_dtype=jnp.bfloat16, tb=512,
                         out_dtype=jnp.float32):
    """Returns a jitted fwd(x) -> (out, probs1) with params prepared once."""
    arrays, dims = prepare_params(params, compute_dtype=compute_dtype)
    Din, H = dims["Din"], dims["H"]
    O1, O2, Opad = dims["O1"], dims["O2"], dims["Opad"]

    # VMEM residency budget for the whole-array-resident weights: keep under
    # ~24 MiB so the x/out double-buffer pipeline retains headroom inside
    # v7x's 64 MiB physical (32 MiB default scoped) VMEM. Past this
    # (H ~ 2-4K on v7x, ~4-8K on v5e/v6e) switch W2/W34 to K-tiled BlockSpecs
    # over an "arbitrary" reduction grid axis and set vmem_limit_bytes.
    itemsize = jnp.dtype(compute_dtype).itemsize
    resident_bytes = (Din * H + H * H + H * Opad) * itemsize + (2 * H + Opad) * 4
    if resident_bytes > 24 * 1024 * 1024:
        # TODO(synk): K-tile W2/W34 for large hidden_dim instead of erroring.
        raise NotImplementedError(
            "hidden_dim too large for whole-array VMEM residency; "
            "K-tile W2/W34 with an 'arbitrary' reduction axis.")

    kernel = functools.partial(_decoder_kernel, o1=O1, o2=O2)
    # Weights/biases never change across the batch grid: keep them whole-array
    # resident in VMEM instead of double-buffering them through the pipeline.
    vmem_resident = pl.BlockSpec(memory_space=pltpu.MemorySpace.VMEM)

    @jax.jit
    def fwd(x):
        B, Din_x = x.shape
        assert Din_x == Din, "input feature dim mismatch"

        # Adaptive batch tiling:
        #  - single tile (zero grid-step overhead) for small B,
        #  - >= 2 (even) tiles once B >= 256 so v7x's two TensorCores both
        #    get work along the "parallel" batch axis,
        #  - tiles capped at tb rows (per-step overhead amortizes; HBM
        #    roofline fraction rises with tile size).
        n_tiles = max(1, -(-B // tb))
        if B >= 256 and n_tiles < 2:
            n_tiles = 2
        if n_tiles > 1 and n_tiles % 2:
            n_tiles += 1
        if n_tiles == 1:
            tb_eff, Bp = B, B
        else:
            tb_eff = _round_up(-(-B // n_tiles), 8)  # sublane multiple
            Bp = n_tiles * tb_eff

        xp = x
        if Bp != B:
            # Ragged multi-tile batch: pad rows (computed then discarded).
            # Pre-pad upstream to a multiple of 8*n_tiles rows to avoid this
            # extra read+write of x.
            xp = jnp.pad(x, ((0, Bp - B), (0, 0)))

        batch_map = lambda i: (i, 0)
        fused = pl.pallas_call(
            kernel,
            grid_spec=pltpu.PrefetchScalarGridSpec(
                num_scalar_prefetch=0,
                grid=(Bp // tb_eff,),
                in_specs=[
                    pl.BlockSpec((tb_eff, Din), batch_map),  # x (f32, pipelined)
                    vmem_resident,                           # W1
                    vmem_resident,                           # b1
                    vmem_resident,                           # W2
                    vmem_resident,                           # b2
                    vmem_resident,                           # W34 (fc3|fc4)
                    vmem_resident,                           # b34
                ],
                out_specs=pl.BlockSpec((tb_eff, Opad), batch_map),
            ),
            out_shape=jax.ShapeDtypeStruct((Bp, Opad), out_dtype),
            compiler_params=pltpu.CompilerParams(
                dimension_semantics=("parallel",)),
        )(xp, arrays["W1"], arrays["b1"], arrays["W2"], arrays["b2"],
          arrays["W34"], arrays["b34"])

        fused_b = fused[:B]
        out = fused_b[:, :O1]
        probs1 = fused_b[:, O1:O1 + O2]
        return out, probs1

    return fwd


def init_params(key, input_dim1, hidden_dim, output_dim1, output_dim2):
    """Deterministic synthetic init (uniform, PyTorch-Linear-like scale)."""
    ks = jax.random.split(key, 8)

    def lin(kw, kb, fan_in, fan_out):
        bound = 1.0 / jnp.sqrt(fan_in)
        W = jax.random.uniform(kw, (fan_in, fan_out), jnp.float32, -bound, bound)
        b = jax.random.uniform(kb, (fan_out,), jnp.float32, -bound, bound)
        return W, b

    W1, b1 = lin(ks[0], ks[1], input_dim1, hidden_dim)
    W2, b2 = lin(ks[2], ks[3], hidden_dim, hidden_dim)
    W3, b3 = lin(ks[4], ks[5], hidden_dim, output_dim1)
    W4, b4 = lin(ks[6], ks[7], hidden_dim, output_dim2)
    return {"W1": W1, "b1": b1, "W2": W2, "b2": b2,
            "W3": W3, "b3": b3, "W4": W4, "b4": b4}


def decoder_reference(x, p):
    h = jax.nn.relu(x @ p["W1"] + p["b1"])
    h = jax.nn.relu(h @ p["W2"] + p["b2"])
    out = h @ p["W3"] + p["b3"]
    probs1 = jax.nn.softmax(h @ p["W4"] + p["b4"], axis=-1)
    return out, probs1


if __name__ == "__main__":
    key = jax.random.PRNGKey(0)
    k_param, k_x = jax.random.split(key)

    # Small shapes consistent with the module's forward.
    B, input_dim1, hidden_dim, output_dim1, output_dim2 = 16, 32, 64, 16, 8

    params = init_params(k_param, input_dim1, hidden_dim, output_dim1, output_dim2)
    x = jax.random.normal(k_x, (B, input_dim1), jnp.float32)

    ref_out, ref_probs = decoder_reference(x, params)

    # f32 compute path: tight check against the pure-JAX reference.
    fwd_f32 = make_decoder_forward(params, compute_dtype=jnp.float32)
    out_f32, probs_f32 = fwd_f32(x)
    out_f32 = jax.block_until_ready(out_f32)
    probs_f32 = jax.block_until_ready(probs_f32)
    assert jnp.allclose(out_f32, ref_out, atol=1e-4, rtol=1e-4)
    assert jnp.allclose(probs_f32, ref_probs, atol=1e-4, rtol=1e-4)
    assert jnp.allclose(jnp.sum(probs_f32, axis=-1), 1.0, atol=1e-4)

    # bf16 compute path (default, MXU-native on v5e/v6e/v7x): looser tolerance.
    fwd_bf16 = make_decoder_forward(params)
    out_bf, probs_bf = fwd_bf16(x)
    out_bf = jax.block_until_ready(out_bf)
    probs_bf = jax.block_until_ready(probs_bf)
    assert jnp.allclose(out_bf, ref_out, atol=5e-2, rtol=5e-2)
    assert jnp.allclose(probs_bf, ref_probs, atol=5e-3, rtol=5e-2)
    assert jnp.allclose(jnp.sum(probs_bf, axis=-1), 1.0, atol=1e-3)

    print("KERNEL_OK")
</pallas_src>

<mosaic_0001>
module attributes {stable_mosaic.version = 11 : i64} {
  func.func @_decoder_kernel(%arg0: i32, %arg1: memref<16x32xf32, #tpu.memory_space<vmem>>, %arg2: memref<32x64xf32, #tpu.memory_space<vmem>>, %arg3: memref<1x64xf32, #tpu.memory_space<vmem>>, %arg4: memref<64x64xf32, #tpu.memory_space<vmem>>, %arg5: memref<1x64xf32, #tpu.memory_space<vmem>>, %arg6: memref<64x128xf32, #tpu.memory_space<vmem>>, %arg7: memref<1x128xf32, #tpu.memory_space<vmem>>, %arg8: memref<16x128xf32, #tpu.memory_space<vmem>>) attributes {dimension_semantics = [#tpu.dimension_semantics<parallel>], iteration_bounds = array<i64: 1>, scalar_prefetch = 0 : i64, scratch_operands = 0 : i64, tpu.core_type = #tpu.core_type<tc>, window_params = [{transform_indices = @transform_0, window_bounds = array<i64: 16, 32>}, {pipeline_mode = #tpu.pipeline_mode<synchronous>, transform_indices = @transform_1, window_bounds = array<i64: 32, 64>}, {pipeline_mode = #tpu.pipeline_mode<synchronous>, transform_indices = @transform_2, window_bounds = array<i64: 1, 64>}, {pipeline_mode = #tpu.pipeline_mode<synchronous>, transform_indices = @transform_3, window_bounds = array<i64: 64, 64>}, {pipeline_mode = #tpu.pipeline_mode<synchronous>, transform_indices = @transform_4, window_bounds = array<i64: 1, 64>}, {pipeline_mode = #tpu.pipeline_mode<synchronous>, transform_indices = @transform_5, window_bounds = array<i64: 64, 128>}, {pipeline_mode = #tpu.pipeline_mode<synchronous>, transform_indices = @transform_6, window_bounds = array<i64: 1, 128>}, {transform_indices = @transform_7, window_bounds = array<i64: 16, 128>}]} {
    %c0 = arith.constant 0 : index
    %c0_0 = arith.constant 0 : index
    %0 = vector.load %arg1[%c0, %c0_0] : memref<16x32xf32, #tpu.memory_space<vmem>>, vector<16x32xf32>
    %c0_1 = arith.constant 0 : index
    %c0_2 = arith.constant 0 : index
    %1 = vector.load %arg2[%c0_1, %c0_2] : memref<32x64xf32, #tpu.memory_space<vmem>>, vector<32x64xf32>
    %cst = arith.constant dense<0.000000e+00> : vector<16x64xf32>
    %2 = tpu.matmul %0, %1, %cst {dimension_numbers = #tpu.dot_dimension_numbers<[1], [0], [0], [1], [0, 0, 1, 1], [], []>} : vector<16x32xf32>, vector<32x64xf32>, vector<16x64xf32> -> vector<16x64xf32>
    %c0_3 = arith.constant 0 : index
    %c0_4 = arith.constant 0 : index
    %3 = vector.load %arg3[%c0_3, %c0_4] : memref<1x64xf32, #tpu.memory_space<vmem>>, vector<1x64xf32>
    %4 = vector.broadcast %3 : vector<1x64xf32> to vector<16x64xf32>
    %5 = arith.addf %2, %4 : vector<16x64xf32>
    %cst_5 = arith.constant 0.000000e+00 : f32
    %6 = vector.broadcast %cst_5 : f32 to vector<16x64xf32>
    %7 = arith.maximumf %5, %6 : vector<16x64xf32>
    %c0_6 = arith.constant 0 : index
    %c0_7 = arith.constant 0 : index
    %8 = vector.load %arg4[%c0_6, %c0_7] : memref<64x64xf32, #tpu.memory_space<vmem>>, vector<64x64xf32>
    %cst_8 = arith.constant dense<0.000000e+00> : vector<16x64xf32>
    %9 = tpu.matmul %7, %8, %cst_8 {dimension_numbers = #tpu.dot_dimension_numbers<[1], [0], [0], [1], [0, 0, 1, 1], [], []>} : vector<16x64xf32>, vector<64x64xf32>, vector<16x64xf32> -> vector<16x64xf32>
    %c0_9 = arith.constant 0 : index
    %c0_10 = arith.constant 0 : index
    %10 = vector.load %arg5[%c0_9, %c0_10] : memref<1x64xf32, #tpu.memory_space<vmem>>, vector<1x64xf32>
    %11 = vector.broadcast %10 : vector<1x64xf32> to vector<16x64xf32>
    %12 = arith.addf %9, %11 : vector<16x64xf32>
    %cst_11 = arith.constant 0.000000e+00 : f32
    %13 = vector.broadcast %cst_11 : f32 to vector<16x64xf32>
    %14 = arith.maximumf %12, %13 : vector<16x64xf32>
    %c0_12 = arith.constant 0 : index
    %c0_13 = arith.constant 0 : index
    %15 = vector.load %arg6[%c0_12, %c0_13] : memref<64x128xf32, #tpu.memory_space<vmem>>, vector<64x128xf32>
    %cst_14 = arith.constant dense<0.000000e+00> : vector<16x128xf32>
    %16 = tpu.matmul %14, %15, %cst_14 {dimension_numbers = #tpu.dot_dimension_numbers<[1], [0], [0], [1], [0, 0, 1, 1], [], []>} : vector<16x64xf32>, vector<64x128xf32>, vector<16x128xf32> -> vector<16x128xf32>
    %c0_15 = arith.constant 0 : index
    %c0_16 = arith.constant 0 : index
    %17 = vector.load %arg7[%c0_15, %c0_16] : memref<1x128xf32, #tpu.memory_space<vmem>>, vector<1x128xf32>
    %18 = vector.broadcast %17 : vector<1x128xf32> to vector<16x128xf32>
    %19 = arith.addf %16, %18 : vector<16x128xf32>
    %20 = tpu.iota {dimensions = array<i32: 1>} : vector<1x128xi32>
    %c16_i32 = arith.constant 16 : i32
    %21 = vector.broadcast %c16_i32 : i32 to vector<1x128xi32>
    %22 = arith.cmpi sge, %20, %21 : vector<1x128xi32>
    %c24_i32 = arith.constant 24 : i32
    %23 = vector.broadcast %c24_i32 : i32 to vector<1x128xi32>
    %24 = arith.cmpi slt, %20, %23 : vector<1x128xi32>
    %25 = arith.andi %22, %24 : vector<1x128xi1>
    %cst_17 = arith.constant 0xFF800000 : f32
    %26 = vector.shape_cast %25 : vector<1x128xi1> to vector<1x128xi1>
    %27 = vector.broadcast %26 : vector<1x128xi1> to vector<16x128xi1>
    %28 = vector.broadcast %cst_17 : f32 to vector<16x128xf32>
    %29 = arith.select %27, %19, %28 : vector<16x128xi1>, vector<16x128xf32>
    %cst_18 = arith.constant dense<0xFF800000> : vector<16xf32>
    %30 = vector.multi_reduction <maximumf>, %29, %cst_18 [1] : vector<16x128xf32> to vector<16xf32>
    %31 = vector.shape_cast %30 : vector<16xf32> to vector<16x1xf32>
    %32 = vector.broadcast %31 : vector<16x1xf32> to vector<16x128xf32>
    %33 = arith.subf %29, %32 : vector<16x128xf32>
    %34 = math.exp %33 : vector<16x128xf32>
    %cst_19 = arith.constant 0.000000e+00 : f32
    %35 = vector.shape_cast %25 : vector<1x128xi1> to vector<1x128xi1>
    %36 = vector.broadcast %35 : vector<1x128xi1> to vector<16x128xi1>
    %37 = vector.broadcast %cst_19 : f32 to vector<16x128xf32>
    %38 = arith.select %36, %34, %37 : vector<16x128xi1>, vector<16x128xf32>
    %cst_20 = arith.constant dense<0.000000e+00> : vector<16xf32>
    %39 = vector.multi_reduction <add>, %38, %cst_20 [1] : vector<16x128xf32> to vector<16xf32>
    %40 = vector.shape_cast %39 : vector<16xf32> to vector<16x1xf32>
    %41 = tpu.reciprocal %40 {approx = true} : vector<16x1xf32> -> vector<16x1xf32>
    %42 = arith.mulf %40, %41 : vector<16x1xf32>
    %cst_21 = arith.constant 2.000000e+00 : f32
    %43 = vector.broadcast %cst_21 : f32 to vector<16x1xf32>
    %44 = arith.subf %43, %42 : vector<16x1xf32>
    %45 = arith.mulf %41, %44 : vector<16x1xf32>
    %46 = vector.broadcast %45 : vector<16x1xf32> to vector<16x128xf32>
    %47 = arith.mulf %38, %46 : vector<16x128xf32>
    %48 = vector.shape_cast %25 : vector<1x128xi1> to vector<1x128xi1>
    %49 = vector.broadcast %48 : vector<1x128xi1> to vector<16x128xi1>
    %50 = arith.select %49, %47, %19 : vector<16x128xi1>, vector<16x128xf32>
    %c0_22 = arith.constant 0 : index
    %c0_23 = arith.constant 0 : index
    %51 = vector.load %arg8[%c0_22, %c0_23] : memref<16x128xf32, #tpu.memory_space<vmem>>, vector<16x128xf32>
    tpu.vector_store %arg8[%c0_22, %c0_23], %50 {strides = array<i32>} : memref<16x128xf32, #tpu.memory_space<vmem>>, vector<16x128xf32>,
    return
  }
  func.func @transform_0(%arg0: i32) -> (i32, i32) {
    %c0_i32 = arith.constant 0 : i32
    %c0_i32_0 = arith.constant 0 : i32
    return %arg0, %c0_i32 : i32, i32
  }
  func.func @transform_1(%arg0: i32) -> (i32, i32) {
    %c0_i32 = arith.constant 0 : i32
    %c0_i32_0 = arith.constant 0 : i32
    %c0_i32_1 = arith.constant 0 : i32
    return %c0_i32, %c0_i32_0 : i32, i32
  }
  func.func @transform_2(%arg0: i32) -> (i32, i32) {
    %c0_i32 = arith.constant 0 : i32
    %c0_i32_0 = arith.constant 0 : i32
    %c0_i32_1 = arith.constant 0 : i32
    return %c0_i32, %c0_i32_0 : i32, i32
  }
  func.func @transform_3(%arg0: i32) -> (i32, i32) {
    %c0_i32 = arith.constant 0 : i32
    %c0_i32_0 = arith.constant 0 : i32
    %c0_i32_1 = arith.constant 0 : i32
    return %c0_i32, %c0_i32_0 : i32, i32
  }
  func.func @transform_4(%arg0: i32) -> (i32, i32) {
    %c0_i32 = arith.constant 0 : i32
    %c0_i32_0 = arith.constant 0 : i32
    %c0_i32_1 = arith.constant 0 : i32
    return %c0_i32, %c0_i32_0 : i32, i32
  }
  func.func @transform_5(%arg0: i32) -> (i32, i32) {
    %c0_i32 = arith.constant 0 : i32
    %c0_i32_0 = arith.constant 0 : i32
    %c0_i32_1 = arith.constant 0 : i32
    return %c0_i32, %c0_i32_0 : i32, i32
  }
  func.func @transform_6(%arg0: i32) -> (i32, i32) {
    %c0_i32 = arith.constant 0 : i32
    %c0_i32_0 = arith.constant 0 : i32
    %c0_i32_1 = arith.constant 0 : i32
    return %c0_i32, %c0_i32_0 : i32, i32
  }
  func.func @transform_7(%arg0: i32) -> (i32, i32) {
    %c0_i32 = arith.constant 0 : i32
    %c0_i32_0 = arith.constant 0 : i32
    return %arg0, %c0_i32 : i32, i32
  }
}

</mosaic_0001>

<bundles_post_ra>
// kernel: fwd.1
= control target key start
LH: loop header
LB: loop body
LE: loop exit
PB: predicated region body
PF: predicated region fallthrough
CT: control target
= control target key end

     0   :  { %12 = vsyncpa [#allocation3], 0  ;;  %s527_s0 = inlined_call_operand.hbm [shape: f32[16,32], index: 0, kind: input, shape index: {}]   ;;  %s528_s1 = inlined_call_operand.hbm [shape: f32[32,64], index: 1, kind: input, shape index: {}]   ;;  %s529_s2 = inlined_call_operand.hbm [shape: f32[1,64], index: 2, kind: input, shape index: {}]   ;;  %s530_s3 = inlined_call_operand.hbm [shape: f32[64,64], index: 3, kind: input, shape index: {}]   ;;  %s531_s4 = inlined_call_operand.vmem [shape: f32[1,64], index: 4, kind: input, shape index: {}]   ;;  %s532_s5 = inlined_call_operand.hbm [shape: f32[64,128], index: 5, kind: input, shape index: {}]   ;;  %s533_s6 = inlined_call_operand.vmem [shape: f32[1,128], index: 6, kind: input, shape index: {}]   ;;  %s534_s7 = inlined_call_operand.vmem [shape: f32[16,128], index: 7, kind: output, shape index: {}]  }
   0x1   :  { %13 = vsyncpa [#allocation5], 0 }
   0x2   :  { %14 = vsyncpa [#allocation8], 0  ;;  %s32_s26 = sshll.u32 %s528_s1, 4  ;;  %s433_s27 = smov [#allocation4]   ;;  %s33_s26 = int_to_ptr.hbm [resolvable:$true] %s32_s26 }
   0x3   :  { %s34_s28 = sshll.u32 %s433_s27, 4  ;;  %s56_s8 = sshll.u32 %s530_s3, 4  ;;  %s35_s28 = int_to_ptr.vmem [resolvable:$true] %s34_s28  ;;  %s57_s8 = int_to_ptr.hbm [resolvable:$true] %s56_s8 }
   0x4   :  { %s434_s9 = smov 128   ;;  %s435_s10 = smov 8  }
   0x5   :  { %40 = dma.hbm_to_vmem [thread:$0]  %s33_s26, 512, %s35_s28, [#allocation5], %s434_s9, %s434_s9, %s435_s10  }
   0x6   :  { %s436_s11 = smov [#allocation7]   ;;  %s19_s15 = sshll.u32 %s527_s0, 4  ;;  %s20_s15 = int_to_ptr.hbm [resolvable:$true] %s19_s15 }
   0x7   :  { %s58_s12 = sshll.u32 %s436_s11, 4  ;;  %s46_s17 = sshll.u32 %s529_s2, 4  ;;  %s59_s12 = int_to_ptr.vmem [resolvable:$true] %s58_s12  ;;  %s47_s17 = int_to_ptr.hbm [resolvable:$true] %s46_s17 }
   0x8   :  { %64 = dma.hbm_to_vmem [thread:$0]  %s57_s8, 1024, %s59_s12, [#allocation8], %s434_s9, %s434_s9, %s435_s10  }
   0x9   :  { %s437_s18 = smov [#allocation2]   ;;  %s438_s3 = smov [#allocation6]  }
   0xa   :  { %s21_s19 = sshll.u32 %s437_s18, 4  ;;  %s48_s20 = sshll.u32 %s438_s3, 4  ;;  %s22_s19 = int_to_ptr.vmem [resolvable:$true] %s21_s19  ;;  %s49_s20 = int_to_ptr.vmem [resolvable:$true] %s48_s20 }
   0xb   :  { %27 = dma.hbm_to_vmem [thread:$0]  %s20_s15, 256, %s22_s19, [#allocation3], %s434_s9, %s434_s9, %s435_s10  }
   0xc   :  { %s71_s23 = sshll.u32 %s532_s5, 4  ;;  %s439_s0 = smov [#allocation9]   ;;  %s72_s23 = int_to_ptr.hbm [resolvable:$true] %s71_s23 }
   0xd   :  { %51 = dma.hbm_to_vmem [thread:$0]  %s47_s17, 16, %s49_s20, [#allocation5]  }
   0xe   :  { %s73_s24 = sshll.u32 %s439_s0, 4  ;;  %s74_s24 = int_to_ptr.vmem [resolvable:$true] %s73_s24 }
   0xf   :  { %79 = dma.hbm_to_vmem [thread:$0]  %s72_s23, 1024, %s74_s24, [#allocation8], %s434_s9, %s434_s9, %s435_s10  }
  0x10   :  { %427 = dma.done.wait [#allocation3], 256  }
  0x11   :  { %428 = vsyncadd [#allocation3], 4294967040 }
  0x12   :  { %429 = dma.done.wait [#allocation5], 528  }
  0x13   :  { %430 = vsyncadd [#allocation5], 4294966768 }
  0x14   :  { %431 = dma.done.wait [#allocation8], 2048  }
  0x15   :  { %432 = vsyncadd [#allocation8], 4294965248  ;;  %v107_v0 = vld [vmem:[#allocation4 + $0x18] sm:$0xff]  ;;  %v106_v1 = vld [vmem:[#allocation4 + $0x10] sm:$0xff]  ;;  %vm112_vm0 = vcmask 261120   ;;  %vm156_vm1 = vcmask 523264   ;;  %v229_v36 = vlaneseq }
  0x16   :  { %131 = vmatpush.msra.mxu0 %v107_v0  ;;  %v105_v2 = vld [vmem:[#allocation4 + $0x8] sm:$0xff]  ;;  %v151_v3 = vld [vmem:[#allocation7 + $0x38] sm:$0xff]  ;;  %v150_v4 = vld [vmem:[#allocation7 + $0x30] sm:$0xff] }
  0x17   :  { %v104_v5 = vld [vmem:[#allocation4] sm:$0xff]  ;;  %171 = vmatpush.msra.mxu1 %v151_v3  ;;  %v149_v6 = vld [vmem:[#allocation7 + $0x28] sm:$0xff]  ;;  %281 = vmatpush.msra.mxu3 %v151_v3  ;;  %v103_v10 = vld [vmem:[#allocation2 + $0x8] sm:$0xff]  ;;  %v230_v37 = vand.u32 127, %v229_v36 }
  0x18   :  { %132 = vmatpush.msra.mxu0 %v106_v1  ;;  %v102_v7 = vld [vmem:[#allocation2] sm:$0xff]  ;;  %v148_v8 = vld [vmem:[#allocation7 + $0x20] sm:$0xff]  ;;  %v147_v9 = vld [vmem:[#allocation7 + $0x18] sm:$0xff] }
  0x19   :  { %172 = vmatpush.msra.mxu1 %v150_v4  ;;  %282 = vmatpush.msra.mxu3 %v150_v4  ;;  %v146_v11 = vld [vmem:[#allocation7 + $0x10] sm:$0xff]  ;;  %v145_v12 = vld [vmem:[#allocation7 + $0x8] sm:$0xff]  ;;  %v144_v13 = vld [vmem:[#allocation7] sm:$0xff]  ;;  %vm231_vm2 = vcmp.ge.s32.totalorder %v230_v37, 16  ;;  %vm232_vm3 = vcmp.lt.s32.totalorder %v230_v37, 24 }
  0x1a   :  { %133 = vmatpush.msra.mxu0 %v105_v2  ;;  %v195_v14 = vld [vmem:[#allocation9 + $0x38] sm:$0xff]  ;;  %v194_v15 = vld [vmem:[#allocation9 + $0x30] sm:$0xff]  ;;  %v193_v16 = vld [vmem:[#allocation9 + $0x28] sm:$0xff] }
  0x1b   :  { %173 = vmatpush.msra.mxu1 %v149_v6  ;;  %283 = vmatpush.msra.mxu3 %v149_v6  ;;  %v192_v17 = vld [vmem:[#allocation9 + $0x20] sm:$0xff]  ;;  %v191_v18 = vld [vmem:[#allocation9 + $0x18] sm:$0xff]  ;;  %v190_v26 = vld [vmem:[#allocation9 + $0x10] sm:$0xff] }
  0x1c   :  { %134 = vmatpush.msra.mxu0 %v104_v5  ;;  %214 = vmatpush.msra.mxu2 %v195_v14  ;;  %v296_v19 = vld [vmem:[#allocation6] ss:$0 sm:$0xff]  ;;  %v189_v27 = vld [vmem:[#allocation9 + $0x8] sm:$0xff]  ;;  %v188_v28 = vld [vmem:[#allocation9] sm:$0xff] }
  0x1d   :  { %275 = vmatmul.msk.f32.vlgmr.msra.gmra.mxu0 %vm112_vm0, %v102_v7  ;;  %174 = vmatpush.msra.mxu1 %v148_v8  ;;  %v297_v29 = vld [vmem:[%s531_s4] ss:$0 sm:$0xff]  ;;  %vm505_vm4 = vmand %vm231_vm2, %vm232_vm3 }
  0x1e   :  { %284 = vmatpush.msra.mxu3 %v148_v8  ;;  %215 = vmatpush.msra.mxu2 %v194_v15  ;;  %v298_v38 = vld [vmem:[%s533_s6] ss:$0 sm:$0xff] }
  0x1f   :  { %175 = vmatpush.msra.mxu1 %v147_v9 }
  0x20   :  { %285 = vmatpush.msra.mxu3 %v147_v9  ;;  %216 = vmatpush.msra.mxu2 %v193_v16 }
  0x21   :  { %176 = vmatpush.msra.mxu1 %v146_v11 }
  0x22   :  { %286 = vmatpush.msra.mxu3 %v146_v11  ;;  %217 = vmatpush.msra.mxu2 %v192_v17 }
  0x23   :  { %177 = vmatpush.msra.mxu1 %v145_v12 }
  0x24   :  { %287 = vmatpush.msra.mxu3 %v145_v12  ;;  %218 = vmatpush.msra.mxu2 %v191_v18 }
  0x25   :  { %276 = vmatmul.msk.f32.gmra.mxu0 %vm112_vm0, %v103_v10  ;;  %178 = vmatpush.msra.mxu1 %v144_v13 }
  0x26   :  { %288 = vmatpush.msra.mxu3 %v144_v13  ;;  %219 = vmatpush.msra.mxu2 %v190_v26 }
  0x28   :  { %220 = vmatpush.msra.mxu2 %v189_v27 }
  0x2a   :  { %221 = vmatpush.msra.mxu2 %v188_v28 }
  0x9a   :  { %v136_v20 = vpop.f32.mrf.mxu0 }
  0x9b   :  { %v137_v21 = vadd.f32 %v296_v19, %v136_v20 }
  0x9d   :  { %v142_v22 = vmax.f32 %v137_v21, 0.0 }
  0x9f   :  { %277 = vmatmul.msk.f32.vlgmr.msra.gmra.mxu1 %vm156_vm1, %v142_v22 }
  0xa2   :  { %v139_v23 = vpop.f32.mrf.mxu0 }
  0xa3   :  { %v140_v24 = vadd.f32 %v296_v19, %v139_v23 }
  0xa5   :  { %v143_v25 = vmax.f32 %v140_v24, 0.0 }
  0xa7   :  { %278 = vmatmul.msk.f32.vlgmr.msra.gmra.mxu3 %vm156_vm1, %v143_v25 }
 0x11c   :  { %v180_v30 = vpop.f32.mrf.mxu1 }
 0x11d   :  { %v181_v31 = vadd.f32 %v297_v29, %v180_v30 }
 0x11f   :  { %v186_v32 = vmax.f32 %v181_v31, 0.0 }
 0x121   :  { %279 = vmatmul.msk.f32.vlgmr.msra.gmra.mxu2 %vm156_vm1, %v186_v32 }
 0x12a   :  { %v183_v33 = vpop.f32.mrf.mxu3 }
 0x12b   :  { %v184_v34 = vadd.f32 %v297_v29, %v183_v33 }
 0x12d   :  { %v187_v35 = vmax.f32 %v184_v34, 0.0 }
 0x12f   :  { %280 = vmatmul.msk.f32.gmra.mxu2 %vm156_vm1, %v187_v35 }
 0x1a4   :  { %v223_v39 = vpop.f32.mrf.mxu2 }
 0x1a5   :  { %v224_v41 = vadd.f32 %v298_v38, %v223_v39 }
 0x1a7   :  { %v236_v42 = vsel %vm505_vm4, %v224_v41, -inf }
 0x1a8   :  { %238 = vmax.xlane.f32.xlu0 %v236_v42 }
 0x1b2   :  { %v226_v43 = vpop.f32.mrf.mxu2 }
 0x1b3   :  { %v227_v44 = vadd.f32 %v298_v38, %v226_v43 }
 0x1b5   :  { %v237_v45 = vsel %vm505_vm4, %v227_v44, -inf }
 0x1b6   :  { %240 = vmax.xlane.f32.xlu0 %v237_v45 }
 0x21b   :  { %v239_v46 = vpop.xlane.xlu0 %238 }
 0x21c   :  { %v242_v47 = vsub.f32 %v236_v42, %v239_v46 }
 0x21e   :  { %v244_v48 = vmul.f32 1.442695, %v242_v47 }
 0x220   :  { %299 = vpow2.f32 %v244_v48 }
 0x226   :  { %v300_v49 = vpop.eup %299 }
 0x227   :  { %v248_v50 = vsel %vm505_vm4, %v300_v49, 0.0 }
 0x228   :  { %250 = vadd.xlane.f32.xlu1 %v248_v50 }
 0x229   :  { %v241_v51 = vpop.xlane.xlu0 %240 }
 0x22a   :  { %v243_v52 = vsub.f32 %v237_v45, %v241_v51 }
 0x22c   :  { %v246_v53 = vmul.f32 1.442695, %v243_v52 }
 0x22e   :  { %301 = vpow2.f32 %v246_v53 }
 0x234   :  { %v302_v54 = vpop.eup %301 }
 0x235   :  { %v249_v55 = vsel %vm505_vm4, %v302_v54, 0.0 }
 0x236   :  { %252 = vadd.xlane.f32.xlu1 %v249_v55 }
 0x29b   :  { %v251_v56 = vpop.xlane.xlu1 %250 }
 0x29c   :  { %303 = vrcp.f32 %v251_v56 }
 0x2a2   :  { %v304_v57 = vpop.eup %303 }
 0x2a3   :  { %v256_v58 = vmul.f32 %v304_v57, %v251_v56 }
 0x2a5   :  { %v258_v59 = vsub.f32 2.0, %v256_v58 }
 0x2a7   :  { %v260_v60 = vmul.f32 %v304_v57, %v258_v59 }
 0x2a9   :  { %v262_v61 = vmul.f32 %v260_v60, %v248_v50  ;;  %v253_v62 = vpop.xlane.xlu1 %252 }
 0x2aa   :  { %305 = vrcp.f32 %v253_v62 }
 0x2ab   :  { %v264_v63 = vsel %vm505_vm4, %v262_v61, %v224_v41 }
 0x2ac   :  { %266 = vst [vmem:[%s534_s7] sm:$0xff] %v264_v63 }
 0x2b0   :  { %v306_v0 = vpop.eup %305 }
 0x2b1   :  { %v257_v1 = vmul.f32 %v306_v0, %v253_v62 }
 0x2b3   :  { %v259_v2 = vsub.f32 2.0, %v257_v1 }
 0x2b5   :  { %v261_v3 = vmul.f32 %v306_v0, %v259_v2 }
 0x2b7   :  { %v263_v4 = vmul.f32 %v261_v3, %v249_v55 }
 0x2b9   :  { %v265_v5 = vsel %vm505_vm4, %v263_v4, %v227_v44 }
 0x2ba   :  { %267 = vst [vmem:[%s534_s7 + $0x8] sm:$0xff] %v265_v5 }
 0x2bb   :  { %272 = vsyncpa [#allocation3], 1 }
 0x2bc   :  { %273 = vsyncpa [#allocation5], 1 }
 0x2bd   :  { %274 = vsyncpa [#allocation8], 1 }

</bundles_post_ra>
